<compile_context>
chip_gen: v6e
topology: v6e:2x2x1
jax: 0.10.0
libtpu: 0.0.40
codegen_flags: <defaults>
</compile_context>

<pallas_src>
import functools
import math

import jax
import jax.numpy as jnp
from jax import lax
from jax.experimental import pallas as pl
from jax.experimental.pallas import tpu as pltpu


def _round_up(x: int, m: int) -> int:
    return ((x + m - 1) // m) * m


def _llg_kernel(x_ref, w_ref, g_ref, b_ref, o_ref, acc_ref, *, eps):
    # x_ref:   (TM, TK)    current row tile / K slab of x
    # w_ref:   (TK, out_)  current K slab of W^T (resident when K_tiles == 1)
    # g_ref:   (1, out_)   LayerNorm gamma (resident)
    # b_ref:   (1, out_)   LayerNorm beta  (resident)
    # o_ref:   (TM, out_)  output tile (resident across the K axis)
    # acc_ref: (TM, out_)  f32 matmul accumulator (VMEM scratch)
    k = pl.program_id(1)
    nk = pl.num_programs(1)

    @pl.when(k == 0)
    def _():
        acc_ref[...] = jnp.zeros_like(acc_ref)

    acc_ref[...] += jnp.dot(
        x_ref[...], w_ref[...], preferred_element_type=jnp.float32
    )

    @pl.when(k == nk - 1)
    def _():
        y = acc_ref[...]                              # (TM, out_) f32
        n = y.shape[-1]
        inv_n = 1.0 / n

        # Fused one-pass LayerNorm statistics.
        mean = jnp.sum(y, axis=-1, keepdims=True) * inv_n
        msq = jnp.sum(y * y, axis=-1, keepdims=True) * inv_n
        var = jnp.maximum(msq - mean * mean, 0.0)

        normed = (y - mean) * lax.rsqrt(var + eps)
        z = normed * g_ref[...] + b_ref[...]

        # Exact GELU: 0.5 * z * (1 + erf(z / sqrt(2)))  (torch default).
        out = 0.5 * z * (1.0 + lax.erf(z * 0.7071067811865476))

        o_ref[...] = out.astype(o_ref.dtype)


def _pick_row_tile(M: int, row_tile: int) -> int:
    """Largest multiple-of-8 tile <= row_tile that divides M, else row_tile."""
    cap = min(row_tile, _round_up(M, 8))
    best = None
    for cand in range(8, min(row_tile, M) + 1, 8):
        if M % cand == 0:
            best = cand
    return best if best is not None else cap


def llg_forward(x, weight, gamma, beta, *, eps=1e-5, row_tile=256, k_tile=None):
    """x: (..., in_); weight: (out_, in_); gamma/beta: (out_,)."""
    out_, in_ = weight.shape
    lead_shape = x.shape[:-1]
    M = int(math.prod(lead_shape)) if lead_shape else 1

    x2 = x.reshape(M, in_)                      # native dtype, no upcast
    wT = jnp.transpose(weight)                  # (in_, out_), native dtype
    g2 = gamma.reshape(1, out_).astype(jnp.float32)
    b2 = beta.reshape(1, out_).astype(jnp.float32)
    out_dtype = x.dtype

    # ---- row tiling (avoid padding when a divisor tile exists) -------------
    TM = _pick_row_tile(M, row_tile)
    M_pad = _round_up(M, TM)
    if M_pad != M:
        x2 = jnp.pad(x2, ((0, M_pad - M), (0, 0)))

    # ---- K (in_) tiling decision -------------------------------------------
    w_itemsize = wT.dtype.itemsize
    w_bytes = in_ * out_ * w_itemsize
    resident_budget = 48 * 1024 * 1024          # fits v7x 64 MiB with headroom

    if k_tile is not None and in_ % k_tile == 0 and k_tile % 128 == 0:
        TK = k_tile
    elif w_bytes <= resident_budget or in_ % 128 != 0:
        TK = in_                                # fully resident weight
    else:
        # Stream W^T in ~8 MiB slabs, 128-aligned, dividing in_.
        target = max(128, (8 * 1024 * 1024) // max(out_ * w_itemsize, 1))
        TK = 128
        for cand in range(128, in_ + 1, 128):
            if in_ % cand == 0 and cand <= target:
                TK = cand
    nk = in_ // TK

    grid = (M_pad // TM, nk)

    # ---- explicit VMEM budget (double-buffered blocks + f32 accumulator) ---
    x_b = x2.dtype.itemsize
    o_b = jnp.dtype(out_dtype).itemsize
    est = (
        2 * TM * TK * x_b            # x tiles
        + 2 * TK * out_ * w_itemsize  # weight slabs
        + 4 * out_ * 4 * 2            # gamma/beta
        + 2 * TM * out_ * o_b         # output tiles
        + TM * out_ * 4               # accumulator scratch
    )
    vmem_limit = int(min(max(2 * est, 32 * 1024 * 1024), 100 * 1024 * 1024))

    out = pl.pallas_call(
        functools.partial(_llg_kernel, eps=float(eps)),
        out_shape=jax.ShapeDtypeStruct((M_pad, out_), out_dtype),
        grid_spec=pltpu.PrefetchScalarGridSpec(
            num_scalar_prefetch=0,
            grid=grid,
            in_specs=[
                pl.BlockSpec((TM, TK), lambda i, k: (i, k)),     # x tile
                pl.BlockSpec((TK, out_), lambda i, k: (k, 0)),   # W^T slab
                pl.BlockSpec((1, out_), lambda i, k: (0, 0)),    # gamma
                pl.BlockSpec((1, out_), lambda i, k: (0, 0)),    # beta
            ],
            out_specs=pl.BlockSpec((TM, out_), lambda i, k: (i, 0)),
            scratch_shapes=[pltpu.VMEM((TM, out_), jnp.float32)],
        ),
        compiler_params=pltpu.CompilerParams(
            dimension_semantics=("parallel", "arbitrary"),
            vmem_limit_bytes=vmem_limit,
        ),
    )(x2, wT, g2, b2)

    if M_pad != M:
        out = out[:M]
    return out.reshape(*lead_shape, out_)


def _llg_reference(x, weight, gamma, beta, eps=1e-5):
    y = jnp.einsum("...i,oi->...o", x, weight).astype(jnp.float32)
    mean = y.mean(-1, keepdims=True)
    var = ((y - mean) ** 2).mean(-1, keepdims=True)
    normed = (y - mean) / jnp.sqrt(var + eps)
    z = normed * gamma.astype(jnp.float32) + beta.astype(jnp.float32)
    out = 0.5 * z * (1.0 + lax.erf(z / jnp.sqrt(2.0).astype(z.dtype)))
    return out.astype(x.dtype)


if __name__ == "__main__":
    key = jax.random.PRNGKey(0)
    kx, kw, kg, kb = jax.random.split(key, 4)

    # ---- Test 1: small shape, row tiling exercised (grid = (2, 1)) ----------
    B, S, in_, out_ = 2, 8, 32, 32
    x = jax.random.normal(kx, (B, S, in_), dtype=jnp.float32)
    weight = jax.random.normal(kw, (out_, in_), dtype=jnp.float32) * 0.1
    gamma = 1.0 + 0.05 * jax.random.normal(kg, (out_,), dtype=jnp.float32)
    beta = 0.05 * jax.random.normal(kb, (out_,), dtype=jnp.float32)

    out = llg_forward(x, weight, gamma, beta, row_tile=8)
    out = jax.block_until_ready(out)
    ref = _llg_reference(x, weight, gamma, beta)
    assert out.shape == (B, S, out_)
    assert jnp.allclose(out, ref, atol=1e-4, rtol=1e-4), "mismatch vs reference (test 1)"

    # ---- Test 2: K-tiled accumulator path exercised (grid = (2, 2)) --------
    in2, out2 = 256, 128
    x_b = jax.random.normal(kx, (B, S, in2), dtype=jnp.float32)
    w_b = jax.random.normal(kw, (out2, in2), dtype=jnp.float32) * 0.05
    g_b = 1.0 + 0.05 * jax.random.normal(kg, (out2,), dtype=jnp.float32)
    b_b = 0.05 * jax.random.normal(kb, (out2,), dtype=jnp.float32)

    out_b = llg_forward(x_b, w_b, g_b, b_b, row_tile=8, k_tile=128)
    out_b = jax.block_until_ready(out_b)
    ref_b = _llg_reference(x_b, w_b, g_b, b_b)
    assert out_b.shape == (B, S, out2)
    assert jnp.allclose(out_b, ref_b, atol=1e-4, rtol=1e-4), "mismatch vs reference (test 2)"

    print("KERNEL_OK")
</pallas_src>

<mosaic_0001>
module attributes {stable_mosaic.version = 11 : i64} {
  func.func @_llg_kernel(%arg0: i32, %arg1: i32, %arg2: memref<8x32xf32, #tpu.memory_space<vmem>>, %arg3: memref<32x32xf32, #tpu.memory_space<vmem>>, %arg4: memref<1x32xf32, #tpu.memory_space<vmem>>, %arg5: memref<1x32xf32, #tpu.memory_space<vmem>>, %arg6: memref<8x32xf32, #tpu.memory_space<vmem>>, %arg7: memref<8x32xf32, #tpu.memory_space<vmem>>) attributes {dimension_semantics = [#tpu.dimension_semantics<parallel>, #tpu.dimension_semantics<arbitrary>], iteration_bounds = array<i64: 2, 1>, scalar_prefetch = 0 : i64, scratch_operands = 1 : i64, tpu.core_type = #tpu.core_type<tc>, window_params = [{transform_indices = @transform_0, window_bounds = array<i64: 8, 32>}, {transform_indices = @transform_1, window_bounds = array<i64: 32, 32>}, {pipeline_mode = #tpu.pipeline_mode<synchronous>, transform_indices = @transform_2, window_bounds = array<i64: 1, 32>}, {pipeline_mode = #tpu.pipeline_mode<synchronous>, transform_indices = @transform_3, window_bounds = array<i64: 1, 32>}, {transform_indices = @transform_4, window_bounds = array<i64: 8, 32>}]} {
    %c0_i32 = arith.constant 0 : i32
    %0 = arith.cmpi eq, %arg1, %c0_i32 : i32
    %1 = arith.extui %0 : i1 to i32
    %c0_i32_0 = arith.constant 0 : i32
    %2 = arith.cmpi ne, %1, %c0_i32_0 : i32
    scf.if %2 {
      %cst_10 = arith.constant 0.000000e+00 : f32
      %12 = vector.broadcast %cst_10 : f32 to vector<8x32xf32>
      %c0_11 = arith.constant 0 : index
      %c0_12 = arith.constant 0 : index
      %13 = vector.load %arg7[%c0_11, %c0_12] : memref<8x32xf32, #tpu.memory_space<vmem>>, vector<8x32xf32>
      tpu.vector_store %arg7[%c0_11, %c0_12], %12 {strides = array<i32>} : memref<8x32xf32, #tpu.memory_space<vmem>>, vector<8x32xf32>,
    } else {
    }
    %c0 = arith.constant 0 : index
    %c0_1 = arith.constant 0 : index
    %3 = vector.load %arg7[%c0, %c0_1] : memref<8x32xf32, #tpu.memory_space<vmem>>, vector<8x32xf32>
    %c0_2 = arith.constant 0 : index
    %c0_3 = arith.constant 0 : index
    %4 = vector.load %arg2[%c0_2, %c0_3] : memref<8x32xf32, #tpu.memory_space<vmem>>, vector<8x32xf32>
    %c0_4 = arith.constant 0 : index
    %c0_5 = arith.constant 0 : index
    %5 = vector.load %arg3[%c0_4, %c0_5] : memref<32x32xf32, #tpu.memory_space<vmem>>, vector<32x32xf32>
    %cst = arith.constant dense<0.000000e+00> : vector<8x32xf32>
    %6 = tpu.matmul %4, %5, %cst {dimension_numbers = #tpu.dot_dimension_numbers<[1], [0], [0], [1], [0, 0, 1, 1], [], []>} : vector<8x32xf32>, vector<32x32xf32>, vector<8x32xf32> -> vector<8x32xf32>
    %7 = arith.addf %3, %6 : vector<8x32xf32>
    %c0_6 = arith.constant 0 : index
    %c0_7 = arith.constant 0 : index
    %8 = vector.load %arg7[%c0_6, %c0_7] : memref<8x32xf32, #tpu.memory_space<vmem>>, vector<8x32xf32>
    tpu.vector_store %arg7[%c0_6, %c0_7], %7 {strides = array<i32>} : memref<8x32xf32, #tpu.memory_space<vmem>>, vector<8x32xf32>,
    %c0_i32_8 = arith.constant 0 : i32
    %9 = arith.cmpi eq, %arg1, %c0_i32_8 : i32
    %10 = arith.extui %9 : i1 to i32
    %c0_i32_9 = arith.constant 0 : i32
    %11 = arith.cmpi ne, %10, %c0_i32_9 : i32
    scf.if %11 {
      %c0_10 = arith.constant 0 : index
      %c0_11 = arith.constant 0 : index
      %12 = vector.load %arg7[%c0_10, %c0_11] : memref<8x32xf32, #tpu.memory_space<vmem>>, vector<8x32xf32>
      %cst_12 = arith.constant dense<0.000000e+00> : vector<8xf32>
      %13 = vector.multi_reduction <add>, %12, %cst_12 [1] : vector<8x32xf32> to vector<8xf32>
      %14 = vector.shape_cast %13 : vector<8xf32> to vector<8x1xf32>
      %cst_13 = arith.constant 3.125000e-02 : f32
      %15 = vector.broadcast %cst_13 : f32 to vector<8x1xf32>
      %16 = arith.mulf %14, %15 : vector<8x1xf32>
      %17 = arith.mulf %12, %12 : vector<8x32xf32>
      %cst_14 = arith.constant dense<0.000000e+00> : vector<8xf32>
      %18 = vector.multi_reduction <add>, %17, %cst_14 [1] : vector<8x32xf32> to vector<8xf32>
      %19 = vector.shape_cast %18 : vector<8xf32> to vector<8x1xf32>
      %cst_15 = arith.constant 3.125000e-02 : f32
      %20 = vector.broadcast %cst_15 : f32 to vector<8x1xf32>
      %21 = arith.mulf %19, %20 : vector<8x1xf32>
      %22 = arith.mulf %16, %16 : vector<8x1xf32>
      %23 = arith.subf %21, %22 : vector<8x1xf32>
      %cst_16 = arith.constant 0.000000e+00 : f32
      %24 = vector.broadcast %cst_16 : f32 to vector<8x1xf32>
      %25 = arith.maximumf %23, %24 : vector<8x1xf32>
      %26 = vector.broadcast %16 : vector<8x1xf32> to vector<8x32xf32>
      %27 = arith.subf %12, %26 : vector<8x32xf32>
      %cst_17 = arith.constant 9.99999974E-6 : f32
      %28 = vector.broadcast %cst_17 : f32 to vector<8x1xf32>
      %29 = arith.addf %25, %28 : vector<8x1xf32>
      %30 = math.rsqrt %29 : vector<8x1xf32>
      %31 = vector.broadcast %30 : vector<8x1xf32> to vector<8x32xf32>
      %32 = arith.mulf %27, %31 : vector<8x32xf32>
      %c0_18 = arith.constant 0 : index
      %c0_19 = arith.constant 0 : index
      %33 = vector.load %arg4[%c0_18, %c0_19] : memref<1x32xf32, #tpu.memory_space<vmem>>, vector<1x32xf32>
      %34 = vector.broadcast %33 : vector<1x32xf32> to vector<8x32xf32>
      %35 = arith.mulf %32, %34 : vector<8x32xf32>
      %c0_20 = arith.constant 0 : index
      %c0_21 = arith.constant 0 : index
      %36 = vector.load %arg5[%c0_20, %c0_21] : memref<1x32xf32, #tpu.memory_space<vmem>>, vector<1x32xf32>
      %37 = vector.broadcast %36 : vector<1x32xf32> to vector<8x32xf32>
      %38 = arith.addf %35, %37 : vector<8x32xf32>
      %cst_22 = arith.constant 5.000000e-01 : f32
      %39 = vector.broadcast %cst_22 : f32 to vector<8x32xf32>
      %40 = arith.mulf %39, %38 : vector<8x32xf32>
      %cst_23 = arith.constant 0.707106769 : f32
      %41 = vector.broadcast %cst_23 : f32 to vector<8x32xf32>
      %42 = arith.mulf %38, %41 : vector<8x32xf32>
      %43 = math.erf %42 : vector<8x32xf32>
      %cst_24 = arith.constant 1.000000e+00 : f32
      %44 = vector.broadcast %cst_24 : f32 to vector<8x32xf32>
      %45 = arith.addf %44, %43 : vector<8x32xf32>
      %46 = arith.mulf %40, %45 : vector<8x32xf32>
      %c0_25 = arith.constant 0 : index
      %c0_26 = arith.constant 0 : index
      %47 = vector.load %arg6[%c0_25, %c0_26] : memref<8x32xf32, #tpu.memory_space<vmem>>, vector<8x32xf32>
      tpu.vector_store %arg6[%c0_25, %c0_26], %46 {strides = array<i32>} : memref<8x32xf32, #tpu.memory_space<vmem>>, vector<8x32xf32>,
    } else {
    }
    return
  }
  func.func @transform_0(%arg0: i32, %arg1: i32) -> (i32, i32) {
    %c0_i32 = arith.constant 0 : i32
    return %arg0, %arg1 : i32, i32
  }
  func.func @transform_1(%arg0: i32, %arg1: i32) -> (i32, i32) {
    %c0_i32 = arith.constant 0 : i32
    %c0_i32_0 = arith.constant 0 : i32
    return %arg1, %c0_i32 : i32, i32
  }
  func.func @transform_2(%arg0: i32, %arg1: i32) -> (i32, i32) {
    %c0_i32 = arith.constant 0 : i32
    %c0_i32_0 = arith.constant 0 : i32
    %c0_i32_1 = arith.constant 0 : i32
    return %c0_i32, %c0_i32_0 : i32, i32
  }
  func.func @transform_3(%arg0: i32, %arg1: i32) -> (i32, i32) {
    %c0_i32 = arith.constant 0 : i32
    %c0_i32_0 = arith.constant 0 : i32
    %c0_i32_1 = arith.constant 0 : i32
    return %c0_i32, %c0_i32_0 : i32, i32
  }
  func.func @transform_4(%arg0: i32, %arg1: i32) -> (i32, i32) {
    %c0_i32 = arith.constant 0 : i32
    %c0_i32_0 = arith.constant 0 : i32
    return %arg0, %c0_i32 : i32, i32
  }
}

</mosaic_0001>

<bundles_post_ra>
// kernel: tpu_custom_call.1
= control target key start
LH: loop header
LB: loop body
LE: loop exit
PB: predicated region body
PF: predicated region fallthrough
CT: control target
= control target key end

     0   :  { %s957_s0 = inlined_call_operand.hbm [shape: f32[16,32], index: 0, kind: input, shape index: {}]   ;;  %s958_s1 = inlined_call_operand.hbm [shape: f32[32,32], index: 1, kind: input, shape index: {}]   ;;  %s959_s2 = inlined_call_operand.vmem [shape: f32[1,32], index: 2, kind: input, shape index: {}]   ;;  %s960_s3 = inlined_call_operand.vmem [shape: f32[1,32], index: 3, kind: input, shape index: {}]   ;;  %s961_s4 = inlined_call_operand.hbm [shape: f32[16,32], index: 4, kind: output, shape index: {}]  }
   0x1   :  { %963 = sst [smem:[#allocation12_spill]] %s958_s1 }
   0x2   :  { %9 = vsyncpa [#allocation4], 0 }
   0x3   :  { %11 = vsyncpa [#allocation4 + $0x1], 0 }
   0x4   :  { %12 = vsyncpa [#allocation7], 0 }
   0x5   :  { %13 = vsyncpa [#allocation5], 0 }
   0x6   :  { %15 = vsyncpa [#allocation5 + $0x1], 0  ;;  %s774_s15 = smov 0   ;;  %s776_s16 = smov 0  }
   0x7   :  { %s778_s17 = smov 0   ;;  %s780_s18 = smov 0  }
   0x8   :  { %s782_s19 = smov 0   ;;  %s784_s20 = smov 0  }
   0x9 LB: > { %s487_s21 = sadd.s32 4294967295, %s740_s20   ;;  %s488_s22 = sadd.s32 4294967294, %s740_s20   ;;  %s740_s20 = sphi %s784_s20, %s21_s20   ;;  %s736_s19 = sphi %s782_s19, %s981_s19   ;;  %s732_s18 = sphi %s780_s18, %s980_s18   ;;  %s728_s17 = sphi %s778_s17, %s979_s17   ;;  %s724_s16 = sphi %s776_s16, %s978_s16   ;;  %s720_s15 = sphi %s774_s15, %s977_s15  }
   0xa   : > { %p55_p0 = scmp.ne.s32.totalorder %s724_s16, %s720_s15  ;;  %p808_p1 = scmp.eq.s32.totalorder %s487_s21, 0 }
   0xb   : > { %p812_p2 = scmp.eq.s32.totalorder %s487_s21, 1  ;;  %p153_p3 = scmp.eq.s32.totalorder %s488_s22, 1 }
   0xc   : > { %p818_p4 = por %p808_p1, %p55_p0  ;;  %p489_p5 = scmp.ge.s32.totalorder %s740_s20, 1 }
   0xd   : > { %p823_p6 = por %p153_p3, %p55_p0  ;;  %p160_p7 = scmp.lt.s32.totalorder %s740_s20, 3 }
   0xe   : > { %s966_s25 = scalar_select %p818_p4, 1, 0 }
   0xf   : > { %s967_s26 = scalar_select %p823_p6, 1, 0 }
  0x10   : > { %p828_p8 = pnand %p489_p5, %p160_p7  ;;  %s742_s28 = smov [#allocation6]  }
  0x11   : > { %s175_s29 = sshll.u32 %s742_s28, 4  ;;  %s33_s5 = sadd.s32 1, %s736_s19  ;;  %s176_s29 = int_to_ptr.vmem [resolvable:$true] %s175_s29 }
  0x12   : > { %p529_p9 = pneg %p828_p8  ;;  %s613_s6 = scalar_lea.vmem %s176_s29, 512 }
  0x13   : > { %p614_p13 = scmp.ne.s32.totalorder %s176_s29, %s613_s6  ;;  %p621_p5 = scmp.lt.s32.totalorder %s176_s29, %s176_s29 }
  0x14   : > { %p837_p11 = pnand %p529_p9, %p808_p1  ;;  %p622_p7 = scmp.lt.s32.totalorder %s613_s6, %s613_s6 }
  0x16   : > { %p604_p12 = pneg %p837_p11  ;;  %p623_p6 = por %p622_p7, %p621_p5 }
  0x18   : > { %p616_p0 = pnand %p614_p13, %p604_p12 }
  0x1a   : > { %p617_p3 = pneg %p616_p0 }
  0x1c   : > { %p624_p4 = pnand %p623_p6, %p617_p3 }
  0x1e   : > { %627 = shalt.err (!%p624_p4)
}
  0x1f   : > { %s743_s7 = smov 128   ;;  %s744_s8 = smov 8  }
  0x20   : > { %s970_s1 = sld [smem:[#allocation12_spill]]  ;;  %p35_p6 = scmp.ge.s32.totalorder %s33_s5, 2 }
  0x21   : > { %s42_s11 = sadd.s32 1, %s728_s17  ;;  %p49_p4 = scmp.ne.s32.totalorder %s728_s17, %s724_s16 }
  0x22   : > { %p50_p9 = scmp.eq.s32.totalorder %s740_s20, 0  ;;  %s983_s5 = smov (%p35_p6, %s33_s5), 0 }
  0x23   : > { %p861_p13 = por %p812_p2, %p49_p4  ;;  %s37_s14 = ssub.s32 %s736_s19, %s983_s5 }
  0x24   : > { %p855_p12 = por %p50_p9, %p49_p4  ;;  %p542_p0 = scmp.lt.s32.totalorder %s740_s20, 2 }
  0x25   : > { %s195_s21 = sand.u32 1, %s728_s17  }
  0x26   : > { %532 = dma.hbm_to_vmem [thread:$0]  (!%p837_p11), %s970_s1, 512, %s176_s29, [#allocation7], %s743_s7, %s743_s7, %s744_s8  }
  0x27   : > { %p40_p11 = scmp.eq.s32.totalorder %s37_s14, 0  ;;  %s492_s22 = sshll.u32 %s195_s21, 3 }
  0x28   : > { %s493_s29 = sshll.u32 %s736_s19, 7  ;;  %s199_s8 = scalar_lea.vmem [#allocation3], %s492_s22 }
  0x29   : > { %s870_s28 = scalar_select %p40_p11, %s728_s17, %s42_s11  }
  0x2a   : > { %s205_s7 = scalar_lea.hbm %s957_s0, %s493_s29  ;;  %s207_s9 = sshll.u32 %s199_s8, 4  ;;  %s208_s9 = int_to_ptr.vmem [resolvable:$true] %s207_s9 }
  0x2b   : > { %p878_p2 = pnand %p542_p0, %p855_p12  ;;  %s196_s10 = scalar_lea.sflag [#allocation4], %s195_s21 }
  0x2c   : > { %s641_s14 = scalar_lea.vmem %s208_s9, 128  ;;  %s745_s11 = smov [#allocation3]  }
  0x2d   : > { %p630_p3 = pneg %p878_p2  ;;  %p642_p5 = scmp.ne.s32.totalorder %s208_s9, %s641_s14 }
  0x2e   : > { %s646_s1 = sshll.u32 %s745_s11, 4  ;;  %s647_s1 = int_to_ptr.vmem [resolvable:$false] %s646_s1 }
  0x2f   : > { %p644_p7 = pnand %p642_p5, %p630_p3  ;;  %s648_s29 = scalar_lea.vmem %s647_s1, 256 }
  0x30   : > { %p649_p4 = scmp.lt.s32.totalorder %s208_s9, %s647_s1  ;;  %p650_p9 = scmp.lt.s32.totalorder %s648_s29, %s641_s14 }
  0x31   : > { %p645_p6 = pneg %p644_p7 }
  0x32   : > { %p651_p11 = por %p650_p9, %p649_p4 }
  0x34   : > { %p652_p10 = pnand %p651_p11, %p645_p6 }
  0x36   : > { %655 = shalt.err (!%p652_p10)
}
  0x37   : > { %536 = dma.hbm_to_vmem [thread:$0]  (!%p878_p2), %s205_s7, 128, %s208_s9, %s196_s10  }
  0x38   : > { %216 = sbr.rel (%p828_p8) target bundleno = 480 (0x1e0), region = 36  ;;  %s889_s12 = sand.u32 (!%p828_p8), 1, %s724_s16  }
  0x39   : > { %s495_s21 = sshll.u32 (!%p828_p8), %s889_s12, 3  ;;  %s219_s22 = scalar_lea.sflag (!%p828_p8), [#allocation4], %s889_s12 }
  0x3a   : > { %s222_s1 = scalar_lea.vmem (!%p828_p8), [#allocation3], %s495_s21  ;;  %p974_p12 = scmp.ne.s32.totalorder (!%p828_p8), %s966_s25, 0 }
  0x3d   : > { %707 = dma.done.wait (%p974_p12), %s219_s22, 128  }
  0x3e   : > { %709 = vsyncadd (%p974_p12), %s219_s22, 4294967168 }
  0x3f   : > { %711 = dma.done.wait (%p808_p1), [#allocation7], 512  }
  0x40   : > { %713 = vsyncadd (%p808_p1), [#allocation7], 4294966784  ;;  %vm256_vm0 = vcmask 261120   ;;  %v746_v0 = vmov 0.0   ;;  %vm747_vm1 = vmmov 0   ;;  %v263_v1 = vld [vmem:[#allocation6 + $0x18] sm:$0xff] }
  0x41   : > { %510 = vmatprep.subr.mxu0 %v746_v0  ;;  %518 = vmatprep.mubr.msk.f32.mxu0 %vm747_vm1, %v746_v0  ;;  %257 = vst.msk [vmem:[#allocation2] sm:$0xff] %vm256_vm0, %v746_v0  ;;  %v262_v2 = vld [vmem:[#allocation6 + $0x10] sm:$0xff]  ;;  %v261_v3 = vld [vmem:[#allocation6 + $0x8] sm:$0xff]  ;;  %v260_v4 = vld [vmem:[#allocation6] sm:$0xff]  ;;  %s502_s6 = sshll.u32 %s732_s18, 7  ;;  %s250_s7 = scalar_lea.vmem [#allocation8], %s495_s21 }
  0x42   : > { %511 = vmatpush3.msra.mxu0 %v263_v1  ;;  %v259_v5 = vld [vmem:[%s222_s1] sm:$0xff]  ;;  %v499_v24 = vld [vmem:[%s959_s2] ss:$0 sm:$0xff]  ;;  %s396_s8 = sshll.u32 %s250_s7, 4  ;;  %s394_s10 = scalar_lea.hbm %s961_s4, %s502_s6  ;;  %s397_s8 = int_to_ptr.vmem [resolvable:$true] %s396_s8 }
  0x43   : > { %512 = vmatprep.subr.mxu0 %v746_v0  ;;  %v500_v26 = vld [vmem:[%s960_s3] ss:$0 sm:$0xff]  ;;  %s383_s14 = scalar_lea.sflag [#allocation5], %s889_s12  ;;  %s656_s11 = scalar_lea.vmem %s397_s8, 128 }
  0x44   : > { %513 = vmatpush3.msra.mxu0 %v262_v2  ;;  %p657_p1 = scmp.ne.s32.totalorder %s397_s8, %s656_s11  ;;  %s748_s18 = smov [#allocation8]  }
  0x45   : > { %514 = vmatprep.subr.mxu0 %v746_v0  ;;  %s660_s29 = sshll.u32 %s748_s18, 4  ;;  %s661_s29 = int_to_ptr.vmem [resolvable:$false] %s660_s29 }
  0x46   : > { %515 = vmatpush3.msra.mxu0 %v261_v3  ;;  %p658_p8 = pnand %p657_p1, %p861_p13  ;;  %s662_s21 = scalar_lea.vmem %s661_s29, 256 }
  0x47   : > { %516 = vmatprep.subr.mxu0 %v746_v0  ;;  %p663_p0 = scmp.lt.s32.totalorder %s397_s8, %s661_s29  ;;  %p664_p2 = scmp.lt.s32.totalorder %s662_s21, %s656_s11 }
  0x48   : > { %517 = vmatpush3.msra.mxu0 %v260_v4  ;;  %v258_v6 = vld [vmem:[#allocation2] sm:$0xff]  ;;  %p659_p10 = pneg %p658_p8 }
  0x49   : > { %519 = vmatmul.mubr.msk.f32.vlgmr.msra.gmra.mxu0 %vm256_vm0, %v259_v5  ;;  %p665_p3 = por %p664_p2, %p663_p0 }
  0x4b   : > { %p666_p5 = pnand %p665_p3, %p659_p10 }
 0x109   : > { %v334_v7 = vpop.f32.mrf.mxu0 }
 0x10a   : > { %v338_v8 = vadd.f32 %v334_v7, %v258_v6 }
 0x10b   : > { %v520_v9 = vpop.f32.mrf.mxu0 }
 0x10c   : > { %339 = vst.msk [vmem:[#allocation2] sm:$0xff] %vm256_vm0, %v338_v8 }
 0x113   : > { %v343_v10 = vld [vmem:[#allocation2] sm:$0xff] }
 0x114   : > { %v344_v11 = vsel %vm256_vm0, %v343_v10, 0.0  ;;  %v348_v12 = vmul.f32 %v343_v10, %v343_v10 }
 0x115   : > { %345 = vadd.xlane.f32.xlu0 %v344_v11 }
 0x116   : > { %v349_v13 = vsel %vm256_vm0, %v348_v12, 0.0 }
 0x119   : > { %350 = vadd.xlane.f32.xlu0 %v349_v13 }
 0x19e   : > { %v346_v14 = vpop.xlane.xlu0 %345 }
 0x19f   : > { %v347_v15 = vmul.f32 0.03125, %v346_v14 }
 0x1a1   : > { %v353_v17 = vmul.f32 %v347_v15, %v347_v15  ;;  %v356_v22 = vsub.f32 %v343_v10, %v347_v15 }
 0x1a2   : > { %v351_v16 = vpop.xlane.xlu0 %350 }
 0x1a3   : > { %v352_v18 = vmul.f32 0.03125, %v351_v16 }
 0x1a5   : > { %v354_v19 = vsub.f32 %v352_v18, %v353_v17 }
 0x1a7   : > { %v355_v20 = vmax.f32 %v354_v19, 0.0 }
 0x1a9   : > { %v357_v21 = vadd.f32 1e-05, %v355_v20 }
 0x1ab   : > { %598 = vrsqrt.f32 %v357_v21 }
 0x1b8   : > { %v599_v23 = vpop.eup %598 }
 0x1b9   : > { %v359_v25 = vmul.f32 %v599_v23, %v356_v22 }
 0x1bb   : > { %v367_v27 = vmul.f32 %v499_v24, %v359_v25 }
 0x1bd   : > { %v375_v28 = vadd.f32 %v500_v26, %v367_v27 }
 0x1bf   : > { %v377_v29 = vmul.f32 0.70710677, %v375_v28  ;;  %v376_v31 = vmul.f32 0.5, %v375_v28 }
 0x1c1   : > { %600 = verf.f32 %v377_v29 }
 0x1ce   : > { %v601_v30 = vpop.eup %600 }
 0x1cf   : > { %v379_v32 = vadd.f32 1.0, %v601_v30 }
 0x1d1   : > { %v380_v33 = vmul.f32 %v379_v32, %v376_v31 }
 0x1d3   : > { %381 = vst.msk [vmem:[%s250_s7] sm:$0xff] %vm256_vm0, %v380_v33 }
 0x1d4   : > { %669 = shalt.err (!%p666_p5)
}
 0x1d5   : > { %s670_s22 = scalar_lea.hbm %s394_s10, 128  ;;  %s674_s23 = scalar_lea.hbm %s961_s4, 256 }
 0x1d6   : > { %p671_p7 = scmp.ne.s32.totalorder %s394_s10, %s670_s22  ;;  %p675_p9 = scmp.lt.s32.totalorder %s394_s10, %s961_s4 }
 0x1d7   : > { %p676_p11 = scmp.lt.s32.totalorder %s674_s23, %s670_s22 }
 0x1d8   : > { %p672_p6 = pnand %p671_p7, %p861_p13 }
 0x1d9   : > { %p677_p12 = por %p676_p11, %p675_p9 }
 0x1da   : > { %p673_p4 = pneg %p672_p6 }
 0x1dc   : > { %p678_p1 = pnand %p677_p12, %p673_p4 }
 0x1de   : > { %681 = shalt.err (!%p678_p1)
}
 0x1df   : > { %527 = dma.vmem_to_hbm [thread:$0]  (%p861_p13), %s397_s8, 128, %s394_s10, %s383_s14  }
 0x1e0 PF: > { %s408_s30 = sand.u32 1, %s720_s15   ;;  %p975_p8 = scmp.ne.s32.totalorder %s967_s26, 0 }
 0x1e1   : > { %p976_p10 = scmp.ge.s32.totalorder %s740_s20, 2  ;;  %s409_s6 = scalar_lea.sflag [#allocation5], %s408_s30 }
 0x1e3   : > { %p538_p0 = pnand %p976_p10, %p975_p8 }
 0x1e5   : > { %p539_p2 = pneg %p538_p0 }
 0x1e7   : > { %715 = dma.done.wait (%p539_p2), %s409_s6, 128  }
 0x1e8   : > { %717 = vsyncadd (%p539_p2), %s409_s6, 4294967168  ;;  %s21_s20 = sadd.s32 1, %s740_s20   ;;  %s977_s15 = smov %s724_s16 }
 0x1e9   : > { %p18_p3 = scmp.ge.s32.totalorder %s21_s20, 4   ;;  %s978_s16 = smov %s728_s17 }
 0x1ea   : > { %s979_s17 = smov %s870_s28  ;;  %s980_s18 = smov %s736_s19 }
 0x1eb   : > { %s981_s19 = smov %s983_s5  ;;  %20 = sbr.rel (!%p18_p3) target bundleno = 9 (0x9), region = 94 }
 0x1f0   :  { %414 = vsyncpa [#allocation4], 1 }
 0x1f1   :  { %416 = vsyncpa [#allocation4 + $0x1], 1 }
 0x1f2   :  { %417 = vsyncpa [#allocation7], 1 }
 0x1f3   :  { %418 = vsyncpa [#allocation5], 1 }
 0x1f4   :  { %420 = vsyncpa [#allocation5 + $0x1], 1 }

</bundles_post_ra>
